<compile_context>
chip_gen: v5e
topology: v5e:2x2
jax: 0.10.0
libtpu: 0.0.40
codegen_flags: <defaults>
</compile_context>

<pallas_src>
import jax
import jax.numpy as jnp
from jax.experimental import pallas as pl
from jax.experimental.pallas import tpu as pltpu
from functools import partial


def _scalenorm_kernel(scale_ref, x_ref, o_ref, *, eps):
    # scale_ref: (1,) f32 in SMEM (whole array, un-tiled)
    # x_ref / o_ref: (block_rows, hidden) tiles in VMEM
    xf = x_ref[...].astype(jnp.float32)
    # Sum of squares along the hidden (lane) axis, accumulated in f32.
    sq_sum = jnp.sum(xf * xf, axis=-1, keepdims=True)            # (block_rows, 1)
    # max(sqrt(s), eps) == sqrt(max(s, eps^2)) since both sides are >= 0, so the
    # original clamp(min=eps) semantics are preserved exactly. eps^2 must remain
    # a normal f32 (fine for eps >= ~1e-19; the module default is 1e-5).
    inv = scale_ref[0] * jax.lax.rsqrt(jnp.maximum(sq_sum, eps * eps))
    # Mixed-precision broadcast multiply: keep everything in f32 until the final
    # cast so bf16 inputs see a single rounding (matches the f32 reference).
    o_ref[...] = (xf * inv).astype(o_ref.dtype)


def _pick_block_rows(rows, hidden, itemsize, target_tile_bytes):
    """Choose the row tile.

    Returns a sublane-aligned block size that either divides `rows` exactly or
    leaves a single ragged last block (Pallas masks its OOB stores). Guarantees
    at least 2 grid blocks whenever rows allow it so ("parallel",) dimension
    semantics can shard rows across v7x's two TensorCores.
    """
    # Sublane tile of the packed dtype: 8 rows (f32), 16 (bf16), 32 (int8/fp8).
    sublane = max(8, 32 // itemsize)
    if rows <= sublane:
        # One block equal to the full array extent (always a legal block shape).
        return rows
    # Byte budget per input tile: ~target_tile_bytes keeps 2x input + 2x output
    # double buffers plus the f32 upcast temporary within vmem_limit_bytes.
    budget = max(sublane, target_tile_bytes // max(1, hidden * itemsize))
    # Keep at least two grid blocks (v7x megacore sharding).
    half = -(-rows // 2)
    half_aligned = -(-half // sublane) * sublane
    max_block = min(rows, budget, half_aligned)
    max_block = max(sublane, (max_block // sublane) * sublane)
    # Prefer an aligned divisor of rows near the budget: exact tiling, no ragged
    # tail and therefore fully unmasked stores on every block.
    if rows % sublane == 0:
        q = rows // sublane
        limit = max_block // sublane
        best = 0
        d = 1
        while d * d <= q:
            if q % d == 0:
                for cand in (d, q // d):
                    if cand <= limit and cand > best:
                        best = cand
            d += 1
        if best * sublane * 2 >= max_block:       # within 2x of the byte target
            return best * sublane
    # Fallback: ragged last block. OOB tail-row reads are per-row isolated
    # (garbage rows only feed their own masked-out stores), so correctness holds.
    return max_block


def scale_norm(x, learnable_scale, *, eps=1e-5, block_rows=None,
               target_tile_bytes=4 << 20):
    """Apply ScaleNorm over the last axis of `x`.

    x: float array [..., hidden]
    learnable_scale: scalar (python float or 0-d array)
    block_rows: optional row-tile override.
    """
    orig_shape = x.shape
    hidden = orig_shape[-1]
    rows = 1
    for d in orig_shape[:-1]:
        rows *= d
    if rows == 0 or hidden == 0:
        return x
    x2d = x.reshape(rows, hidden)
    itemsize = jnp.dtype(x.dtype).itemsize

    if block_rows is None:
        block_rows = _pick_block_rows(rows, hidden, itemsize, target_tile_bytes)
    block_rows = max(1, min(block_rows, rows))
    num_blocks = pl.cdiv(rows, block_rows)

    scale_arr = jnp.asarray(learnable_scale, dtype=jnp.float32).reshape(1)

    # Advisory cost hint so XLA can schedule the custom call sensibly.
    cost = pl.CostEstimate(
        flops=3 * rows * hidden,
        transcendentals=rows,
        bytes_accessed=2 * rows * hidden * itemsize,
    )

    # TODO(synk): for hidden < 128 (or hidden % 128 != 0) the lane dimension is
    # under-filled (masked partial stores); fold ceil(128/hidden) logical rows
    # into one 128-lane physical row with a segmented lane reduction if such
    # shapes ever matter at scale.
    out2d = pl.pallas_call(
        partial(_scalenorm_kernel, eps=float(eps)),
        out_shape=jax.ShapeDtypeStruct((rows, hidden), x.dtype),
        grid_spec=pltpu.PrefetchScalarGridSpec(
            num_scalar_prefetch=0,
            grid=(num_blocks,),
            in_specs=[
                # Learnable scale: whole (1,) array resident in SMEM, no blocking.
                pl.BlockSpec(memory_space=pltpu.MemorySpace.SMEM),
                pl.BlockSpec((block_rows, hidden), lambda i: (i, 0)),
            ],
            out_specs=pl.BlockSpec((block_rows, hidden), lambda i: (i, 0)),
        ),
        compiler_params=pltpu.CompilerParams(
            dimension_semantics=("parallel",),
            # 48 MiB scoped VMEM: above v5e's 16 MiB default, well inside
            # v5e/v6e's 128 MiB physical, and safely below v7x's 64 MiB
            # physical, so the 4 MiB double-buffered tiles never spill or
            # degrade to unpipelined blocks on any generation.
            vmem_limit_bytes=48 * 1024 * 1024,
        ),
        cost_estimate=cost,
    )(scale_arr, x2d)

    return out2d.reshape(orig_shape)


def _reference(x, learnable_scale, eps):
    xf = x.astype(jnp.float32)
    norm = jnp.linalg.norm(xf, axis=-1, keepdims=True)
    return (xf * learnable_scale / jnp.maximum(norm, eps)).astype(x.dtype)


if __name__ == "__main__":
    # Deterministic setup matching ScaleNorm.__init__:
    #   learnable_scale = hidden_size ** -0.5 (a single learnable scalar)
    eps = 1e-5
    key = jax.random.PRNGKey(0)
    k1, k2, k3 = jax.random.split(key, 3)

    # Case 1: small transformer-like shape (batch=2, seq=8, hidden=32), f32.
    batch, seq, hidden = 2, 8, 32
    x = jax.random.normal(k1, (batch, seq, hidden), dtype=jnp.float32)
    learnable_scale = float(hidden) ** (-0.5)
    out = jax.block_until_ready(scale_norm(x, learnable_scale, eps=eps))
    ref = _reference(x, learnable_scale, eps)
    assert out.shape == x.shape and out.dtype == x.dtype
    assert jnp.allclose(out, ref, atol=1e-6, rtol=1e-5), "mismatch vs reference (case 1)"

    # Case 2: non-divisible row count (rows=15) exercises the ragged last-block
    # path (masked OOB stores on the boundary block) instead of pad+slice.
    b2, s2, h2 = 3, 5, 128
    x2 = jax.random.normal(k2, (b2, s2, h2), dtype=jnp.float32)
    scale2 = float(h2) ** (-0.5)
    out2 = jax.block_until_ready(scale_norm(x2, scale2, eps=eps))
    ref2 = _reference(x2, scale2, eps)
    assert out2.shape == x2.shape and out2.dtype == x2.dtype
    assert jnp.allclose(out2, ref2, atol=1e-6, rtol=1e-5), "mismatch vs reference (case 2)"

    # Case 3: bf16 inputs exercise the 16-row sublane alignment and the
    # mixed-precision (f32) final multiply.
    b3, s3, h3 = 4, 24, 64
    x3 = jax.random.normal(k3, (b3, s3, h3), dtype=jnp.bfloat16)
    scale3 = float(h3) ** (-0.5)
    out3 = jax.block_until_ready(scale_norm(x3, scale3, eps=eps))
    ref3 = _reference(x3, scale3, eps)
    assert out3.shape == x3.shape and out3.dtype == x3.dtype
    assert jnp.allclose(out3.astype(jnp.float32), ref3.astype(jnp.float32),
                        atol=1e-2, rtol=1e-2), "mismatch vs reference (case 3)"

    print("KERNEL_OK")
</pallas_src>

<mosaic_0001>
module attributes {stable_mosaic.version = 11 : i64} {
  func.func @_scalenorm_kernel(%arg0: i32, %arg1: memref<1xf32, #tpu.memory_space<smem>>, %arg2: memref<8x32xf32, #tpu.memory_space<vmem>>, %arg3: memref<8x32xf32, #tpu.memory_space<vmem>>) attributes {dimension_semantics = [#tpu.dimension_semantics<parallel>], iteration_bounds = array<i64: 2>, scalar_prefetch = 0 : i64, scratch_operands = 0 : i64, tpu.core_type = #tpu.core_type<tc>, window_params = [{transform_indices = @transform_0, window_bounds = array<i64: 1>}, {transform_indices = @transform_1, window_bounds = array<i64: 8, 32>}, {transform_indices = @transform_2, window_bounds = array<i64: 8, 32>}]} {
    %c0 = arith.constant 0 : index
    %c0_0 = arith.constant 0 : index
    %0 = vector.load %arg2[%c0, %c0_0] : memref<8x32xf32, #tpu.memory_space<vmem>>, vector<8x32xf32>
    %1 = arith.mulf %0, %0 : vector<8x32xf32>
    %cst = arith.constant dense<0.000000e+00> : vector<8xf32>
    %2 = vector.multi_reduction <add>, %1, %cst [1] : vector<8x32xf32> to vector<8xf32>
    %3 = vector.shape_cast %2 : vector<8xf32> to vector<8x1xf32>
    %c0_1 = arith.constant 0 : index
    %4 = memref.load %arg1[%c0_1] : memref<1xf32, #tpu.memory_space<smem>>
    %cst_2 = arith.constant 1.000000e-10 : f32
    %5 = vector.broadcast %cst_2 : f32 to vector<8x1xf32>
    %6 = arith.maximumf %3, %5 : vector<8x1xf32>
    %7 = math.rsqrt %6 : vector<8x1xf32>
    %8 = vector.broadcast %4 : f32 to vector<8x1xf32>
    %9 = arith.mulf %8, %7 : vector<8x1xf32>
    %10 = vector.broadcast %9 : vector<8x1xf32> to vector<8x32xf32>
    %11 = arith.mulf %0, %10 : vector<8x32xf32>
    %c0_3 = arith.constant 0 : index
    %c0_4 = arith.constant 0 : index
    %12 = vector.load %arg3[%c0_3, %c0_4] : memref<8x32xf32, #tpu.memory_space<vmem>>, vector<8x32xf32>
    tpu.vector_store %arg3[%c0_3, %c0_4], %11 {strides = array<i32>} : memref<8x32xf32, #tpu.memory_space<vmem>>, vector<8x32xf32>,
    return
  }
  func.func @transform_0(%arg0: i32) -> i32 {
    %c0_i32 = arith.constant 0 : i32
    %c0_i32_0 = arith.constant 0 : i32
    return %c0_i32 : i32
  }
  func.func @transform_1(%arg0: i32) -> (i32, i32) {
    %c0_i32 = arith.constant 0 : i32
    %c0_i32_0 = arith.constant 0 : i32
    return %arg0, %c0_i32 : i32, i32
  }
  func.func @transform_2(%arg0: i32) -> (i32, i32) {
    %c0_i32 = arith.constant 0 : i32
    %c0_i32_0 = arith.constant 0 : i32
    return %arg0, %c0_i32 : i32, i32
  }
}

</mosaic_0001>

<bundles_post_ra>
// kernel: tpu_custom_call.1
= control target key start
LH: loop header
LB: loop body
LE: loop exit
PB: predicated region body
PF: predicated region fallthrough
CT: control target
= control target key end

     0   :  { %s575_s0 = inlined_call_operand.<no memory space> [shape: f32[1], index: 0, kind: input, shape index: {}]   ;;  %s576_s1 = inlined_call_operand.hbm [shape: f32[16,32], index: 1, kind: input, shape index: {}]   ;;  %s577_s2 = inlined_call_operand.hbm [shape: f32[16,32], index: 2, kind: output, shape index: {}]  }
   0x1   :  { %7 = sst [smem:[#allocation2]] %s575_s0 }
   0x2   :  { %8 = vsyncpa [#allocation4], 0 }
   0x3   :  { %10 = vsyncpa [#allocation4 + $0x1], 0 }
   0x4   :  { %11 = vsyncpa [#allocation5], 0 }
   0x5   :  { %13 = vsyncpa [#allocation5 + $0x1], 0  ;;  %s446_s11 = smov 0   ;;  %s448_s12 = smov 0  }
   0x6   :  { %s450_s13 = smov 0   ;;  %s452_s14 = smov 0  }
   0x7 LB: > { %s467_s0 = sadd.s32 4294967295, %s426_s14   ;;  %s270_s15 = sadd.s32 4294967294, %s426_s14   ;;  %s426_s14 = sphi %s452_s14, %s587_s14   ;;  %s422_s13 = sphi %s450_s13, %s586_s13   ;;  %s418_s12 = sphi %s448_s12, %s585_s12   ;;  %s414_s11 = sphi %s446_s11, %s584_s11  }
   0x8   : > { %s471_s16 = sadd.s32 1, %s426_s14   ;;  %s47_s17 = sadd.s32 1, %s422_s13 }
   0x9   : > { %s44_s18 = ssub.s32 %s426_s14, %s471_s16  ;;  %p54_p0 = scmp.ne.s32.totalorder %s422_s13, %s418_s12 }
   0xa   : > { %p45_p1 = scmp.eq.s32.totalorder %s44_s18, 0  ;;  %p55_p2 = scmp.eq.s32.totalorder %s426_s14, 0 }
   0xb   : > { %p60_p3 = scmp.ne.s32.totalorder %s418_s12, %s414_s11  ;;  %p61_p4 = scmp.eq.s32.totalorder %s467_s0, 0 }
   0xc   : > { %s483_s19 = scalar_select %p45_p1, %s422_s13, %s47_s17  }
   0xd   : > { %p485_p5 = por %p55_p2, %p54_p0  ;;  %p489_p6 = por %p61_p4, %p60_p3 }
   0xe   : > { %p84_p7 = scmp.eq.s32.totalorder %s467_s0, 1  ;;  %p90_p8 = scmp.eq.s32.totalorder %s270_s15, 1 }
   0xf   : > { %p294_p10 = scmp.lt.s32.totalorder %s426_s14, 2  ;;  %s113_s24 = sand.u32 1, %s422_s13  }
  0x10   : > { %p496_p11 = por %p84_p7, %p54_p0  ;;  %p500_p12 = por %p90_p8, %p60_p3 }
  0x11   : > { %s274_s25 = sshll.u32 %s426_s14, 3  ;;  %s273_s26 = sshll.u32 %s113_s24, 3 }
  0x12   : > { %s121_s29 = scalar_lea.hbm %s576_s1, %s274_s25  ;;  %s117_s3 = scalar_lea.vmem [#allocation3], %s273_s26 }
  0x13   : > { %s123_s30 = sshll.u32 %s121_s29, 4  ;;  %s125_s4 = sshll.u32 %s117_s3, 4  ;;  %s124_s30 = int_to_ptr.hbm [resolvable:$true] %s123_s30  ;;  %s126_s4 = int_to_ptr.vmem [resolvable:$true] %s125_s4 }
  0x14   : > { %p511_p13 = pnand %p294_p10, %p485_p5  ;;  %p275_p0 = scmp.ge.s32.totalorder %s426_s14, 1 }
  0x15   : > { %p130_p1 = scmp.lt.s32.totalorder %s426_s14, 3  ;;  %s114_s6 = scalar_lea.sflag [#allocation4], %s113_s24 }
  0x16   : > { %s330_s7 = sshra.s32 %s124_s30, 4  ;;  %p334_p3 = pneg %p511_p13  ;;  %s331_s7 = int_to_ptr.hbm [resolvable:$true] %s330_s7 }
  0x17   : > { %s332_s8 = scalar_lea.hbm %s331_s7, 8  ;;  %s337_s15 = scalar_lea.hbm %s576_s1, 16 }
  0x18   : > { %p333_p2 = scmp.ne.s32.totalorder %s331_s7, %s332_s8  ;;  %p338_p5 = scmp.lt.s32.totalorder %s331_s7, %s576_s1 }
  0x19   : > { %p339_p8 = scmp.lt.s32.totalorder %s337_s15, %s332_s8 }
  0x1a   : > { %p335_p4 = pnand %p334_p3, %p333_p2 }
  0x1b   : > { %p340_p10 = por %p339_p8, %p338_p5 }
  0x1c   : > { %p336_p7 = pneg %p335_p4 }
  0x1e   : > { %p341_p9 = pnand %p340_p10, %p336_p7 }
  0x20   : > { %344 = shalt.err (!%p341_p9)
}
  0x21   : > { %289 = dma.hbm_to_vmem [thread:$0]  (!%p511_p13), %s124_s30, 128, %s126_s4, %s114_s6  }
  0x22   : > { %p131_p2 = pnand %p275_p0, %p130_p1 }
  0x23   : > { %s532_s20 = sand.u32 (!%p131_p2), 1, %s418_s12  }
  0x24   : > { %134 = sbr.rel (%p131_p2) target bundleno = 189 (0xbd), region = 28  ;;  %s276_s24 = sshll.u32 (!%p131_p2), %s532_s20, 3 }
  0x25   : > { %s137_s25 = scalar_lea.sflag (!%p131_p2), [#allocation4], %s532_s20  ;;  %s140_s26 = scalar_lea.vmem (!%p131_p2), [#allocation3], %s276_s24 }
  0x29   : > { %405 = dma.done.wait (%p489_p6), %s137_s25, 128  }
  0x2a   : > { %407 = vsyncadd (%p489_p6), %s137_s25, 4294967168  ;;  %v162_v0 = vld [vmem:[%s140_s26] sm:$0xff]  ;;  %vm164_vm0 = vcmask 261120   ;;  %s168_s27 = sld [smem:[#allocation2]]  ;;  %s279_s28 = sshll.u32 %s467_s0, 3 }
  0x2b   : > { %v163_v1 = vmul.f32 %v162_v0, %v162_v0  ;;  %s195_s30 = scalar_lea.hbm %s577_s2, %s279_s28  ;;  %s161_s3 = scalar_lea.vmem [#allocation6], %s276_s24 }
  0x2c   : > { %s197_s4 = sshll.u32 %s161_s3, 4  ;;  %s199_s5 = sshll.u32 %s195_s30, 4  ;;  %s198_s4 = int_to_ptr.vmem [resolvable:$true] %s197_s4  ;;  %s200_s5 = int_to_ptr.hbm [resolvable:$true] %s199_s5 }
  0x2d   : > { %v165_v2 = vsel %vm164_vm0, %v163_v1, 0.0  ;;  %s185_s0 = scalar_lea.sflag [#allocation5], %s532_s20  ;;  %s374_s6 = sshra.s32 %s200_s5, 4  ;;  %s375_s6 = int_to_ptr.hbm [resolvable:$true] %s374_s6 }
  0x2e   : > { %166 = vadd.xlane.f32.xlu0 %v165_v2  ;;  %s376_s7 = scalar_lea.hbm %s375_s6, 8  ;;  %s380_s10 = scalar_lea.hbm %s577_s2, 16 }
  0x2f   : > { %p377_p6 = scmp.ne.s32.totalorder %s375_s6, %s376_s7  ;;  %p381_p0 = scmp.lt.s32.totalorder %s375_s6, %s577_s2 }
  0x30   : > { %v180_v10 = vstv %s168_s27  ;;  %p382_p1 = scmp.lt.s32.totalorder %s380_s10, %s376_s7 }
  0x31   : > { %p378_p9 = pnand %p377_p6, %p496_p11 }
  0x32   : > { %p383_p3 = por %p382_p1, %p381_p0 }
  0x33   : > { %p379_p13 = pneg %p378_p9 }
  0x35   : > { %p384_p4 = pnand %p383_p3, %p379_p13 }
  0xa1   : > { %v167_v3 = vpop.xlane.xlu0 %166 }
  0xa2   : > { %v169_v4 = vmax.f32 %v167_v3, 1e-10 }
  0xa4   : > { %328 = vrsqrt.f32 %v169_v4  ;;  %vm176_vm2 = vweird.f32 %v169_v4 }
  0xaa   : > { %v329_v5 = vpop.eup %328 }
  0xab   : > { %v171_v6 = vmul.f32 %v329_v5, %v169_v4  ;;  %vm177_vm1 = vweird.f32 %v329_v5 }
  0xac   : > { %vm178_vm3 = vmor %vm176_vm2, %vm177_vm1 }
  0xad   : > { %v172_v7 = vmul.f32 %v329_v5, %v171_v6 }
  0xaf   : > { %v173_v8 = vmul.f32 0.5, %v172_v7 }
  0xb1   : > { %v174_v9 = vsub.f32 1.5, %v173_v8 }
  0xb3   : > { %v175_v11 = vmul.f32 %v329_v5, %v174_v9 }
  0xb5   : > { %v179_v12 = vsel %vm178_vm3, %v329_v5, %v175_v11 }
  0xb6   : > { %v181_v13 = vmul.f32 %v180_v10, %v179_v12 }
  0xb8   : > { %v182_v14 = vmul.f32 %v181_v13, %v162_v0 }
  0xba   : > { %183 = vst.msk [vmem:[%s161_s3] sm:$0xff] %vm164_vm0, %v182_v14 }
  0xbb   : > { %387 = shalt.err (!%p384_p4)
}
  0xbc   : > { %284 = dma.vmem_to_hbm [thread:$0]  (%p496_p11), %s198_s4, 128, %s200_s5, %s185_s0  }
  0xbd PF: > { %s211_s18 = sand.u32 1, %s414_s11   ;;  %p583_p7 = scmp.ge.s32.totalorder %s426_s14, 2 }
  0xbe   : > { %s212_s20 = scalar_lea.sflag [#allocation5], %s211_s18 }
  0xbf   : > { %p291_p5 = pnand %p583_p7, %p500_p12 }
  0xc1   : > { %p292_p8 = pneg %p291_p5 }
  0xc3   : > { %409 = dma.done.wait (%p292_p8), %s212_s20, 128  }
  0xc4   : > { %411 = vsyncadd (%p292_p8), %s212_s20, 4294967168  ;;  %p16_p10 = scmp.ge.s32.totalorder %s471_s16, 4   ;;  %s584_s11 = smov %s418_s12 }
  0xc5   : > { %s585_s12 = smov %s422_s13  ;;  %s586_s13 = smov %s483_s19 }
  0xc6   : > { %s587_s14 = smov %s471_s16  ;;  %18 = sbr.rel (!%p16_p10) target bundleno = 7 (0x7), region = 73 }
  0xcb   :  { %218 = vsyncpa [#allocation4], 1 }
  0xcc   :  { %220 = vsyncpa [#allocation4 + $0x1], 1 }
  0xcd   :  { %221 = vsyncpa [#allocation5], 1 }
  0xce   :  { %223 = vsyncpa [#allocation5 + $0x1], 1 }

</bundles_post_ra>
